<compile_context>
chip_gen: v7x
topology: tpu7x:2x2x1
jax: 0.10.0
libtpu: 0.0.40
codegen_flags: <defaults>
</compile_context>

<pallas_src>
import numpy as np
import jax
import jax.numpy as jnp
from jax.experimental import pallas as pl
from jax.experimental.pallas import tpu as pltpu

try:
    from scipy.optimize import linear_sum_assignment as _lsa
except Exception:  # pragma: no cover
    _lsa = None

_M_PAD = 128  # lane-dense target axis (pad true M up to this, slice back on host)


# ----------------------------------------------------------------------------
# Pallas kernel: fused, batched cost-matrix computation
#   cost_mask  = batch_sigmoid_ce_loss(out_mask, tgt_mask)
#   cost_dice  = batch_dice_loss(out_mask, tgt_mask)
#   cost_class = -out_prob[:, tgt_ids]          (in-kernel one-hot matmul)
#   C          = w_mask*cost_mask + w_class*cost_class + w_dice*cost_dice
#   C[:, ~new_inst | padded]   = 1e6
#   C[:Q - num_new_ins, :]     = 1e6
# ----------------------------------------------------------------------------
def _make_cost_kernel(cost_class_w, cost_mask_w, cost_dice_w, num_new_ins):
    def kernel(out_m_ref, tgt_m_ref, prob_ref, ids_ref, ni_ref, o_ref):
        x = out_m_ref[0]          # (Q, P)   mask logits (f32)
        t = tgt_m_ref[0]          # (Mp, P)  binary target masks, zero-padded
        prob = prob_ref[0]        # (Q, Ccls) softmax class probabilities
        ids = ids_ref[0]          # (1, Mp)  int32 target class ids (0 in pad)
        ni = ni_ref[0]            # (1, Mp)  new-instance mask (1.0 = new, 0 = old/pad)
        Q, P = x.shape
        Mp = t.shape[0]
        Ccls = prob.shape[1]

        # one EUP sweep for sigmoid; derive softplus(x) from it (clamp large x)
        sig = jax.nn.sigmoid(x)
        softplus_x = jnp.where(x > 15.0, x, -jnp.log1p(-sig))     # log(1 + e^x)

        # --- single fused MXU contraction for CE + dice numerators ---------
        #   CE: dot(pos,t) + dot(neg,1-t) = dot(pos-neg, t) + rowsum(neg)
        #       and pos - neg = softplus(-x) - softplus(x) = -x
        #   dice numerator: 2 * dot(sigmoid(x), t)
        lhs = jnp.concatenate([-x, 2.0 * sig], axis=0)            # (2Q, P)
        dims = (((1,), (1,)), ((), ()))                           # 'nc,mc->nm'
        fused = jax.lax.dot_general(lhs, t, dims,
                                    preferred_element_type=jnp.float32)  # (2Q, Mp)
        ce_dot = fused[:Q, :]
        numer = fused[Q:, :]

        # batch_sigmoid_ce_loss
        ce = (ce_dot + jnp.sum(softplus_x, axis=-1, keepdims=True)) / float(P)

        # batch_dice_loss
        denom = jnp.sum(sig, axis=-1, keepdims=True) + jnp.sum(t, axis=-1)[None, :]
        dice = 1.0 - (numer + 1.0) / (denom + 1.0)

        # class cost: -out_prob[:, tgt_ids] as a one-hot matmul on the MXU
        cls_iota = jax.lax.broadcasted_iota(jnp.int32, (Ccls, Mp), 0)
        onehot = (cls_iota == ids).astype(jnp.float32)            # (Ccls, Mp)
        cc = -jax.lax.dot_general(prob, onehot, (((1,), (0,)), ((), ())),
                                  preferred_element_type=jnp.float32)  # (Q, Mp)

        # --- weighted sum + single fused sentinel mask ----------------------
        Cmat = cost_mask_w * ce + cost_class_w * cc + cost_dice_w * dice
        row_ids = jax.lax.broadcasted_iota(jnp.int32, (Q, Mp), 0)
        keep = (ni > 0.5) & (row_ids >= Q - num_new_ins)
        o_ref[0] = jnp.where(keep, Cmat, 1e6)

    return kernel


def compute_cost_matrices(out_mask_pts, tgt_mask_pts, out_prob, tgt_ids, new_inst_f,
                          cost_class_w, cost_mask_w, cost_dice_w, num_new_ins):
    """out_mask_pts (B,Q,P) f32, tgt_mask_pts (B,Mp,P) f32, out_prob (B,Q,C) f32,
    tgt_ids (B,1,Mp) i32, new_inst_f (B,1,Mp) f32 -> (B,Q,Mp) f32 cost tensor."""
    B, Q, P = out_mask_pts.shape
    Mp = tgt_mask_pts.shape[1]
    Ccls = out_prob.shape[-1]
    kernel = _make_cost_kernel(cost_class_w, cost_mask_w, cost_dice_w, num_new_ins)
    return pl.pallas_call(
        kernel,
        out_shape=jax.ShapeDtypeStruct((B, Q, Mp), jnp.float32),
        grid=(B,),
        in_specs=[
            pl.BlockSpec((1, Q, P), lambda b: (b, 0, 0)),
            pl.BlockSpec((1, Mp, P), lambda b: (b, 0, 0)),
            pl.BlockSpec((1, Q, Ccls), lambda b: (b, 0, 0)),
            pl.BlockSpec((1, 1, Mp), lambda b: (b, 0, 0)),
            pl.BlockSpec((1, 1, Mp), lambda b: (b, 0, 0)),
        ],
        out_specs=pl.BlockSpec((1, Q, Mp), lambda b: (b, 0, 0)),
        compiler_params=pltpu.CompilerParams(
            dimension_semantics=("parallel",)),  # v7x: batch across both TCs
    )(out_mask_pts, tgt_mask_pts, out_prob, tgt_ids, new_inst_f)


# ----------------------------------------------------------------------------
# Plain-JAX glue: point_sample (F.grid_sample bilinear, align_corners=False,
# zero padding), shared point_coords across the instance axis of one image.
# ----------------------------------------------------------------------------
def point_sample_jax(img, coords):
    # img: (N, H, W) float; coords: (P, 2) in [0, 1] as (x, y)
    N, H, W = img.shape
    gx = 2.0 * coords[:, 0] - 1.0
    gy = 2.0 * coords[:, 1] - 1.0
    ix = ((gx + 1.0) * W - 1.0) / 2.0
    iy = ((gy + 1.0) * H - 1.0) / 2.0
    x0 = jnp.floor(ix).astype(jnp.int32)
    y0 = jnp.floor(iy).astype(jnp.int32)
    x1, y1 = x0 + 1, y0 + 1
    wx1 = ix - x0.astype(ix.dtype)
    wx0 = 1.0 - wx1
    wy1 = iy - y0.astype(iy.dtype)
    wy0 = 1.0 - wy1

    def gather(xi, yi):
        valid = ((xi >= 0) & (xi < W) & (yi >= 0) & (yi < H)).astype(img.dtype)
        xc = jnp.clip(xi, 0, W - 1)
        yc = jnp.clip(yi, 0, H - 1)
        return img[:, yc, xc] * valid[None, :]

    out = (gather(x0, y0) * (wx0 * wy0)[None, :]
           + gather(x1, y0) * (wx1 * wy0)[None, :]
           + gather(x0, y1) * (wx0 * wy1)[None, :]
           + gather(x1, y1) * (wx1 * wy1)[None, :])
    return out  # (N, P)


def _hungarian(C_np):
    if _lsa is not None:
        return _lsa(C_np)
    # TODO(synk): linear_sum_assignment has no Pallas/JAX equivalent; greedy
    # fallback used only if scipy is unavailable (approximate).
    C = np.array(C_np, copy=True)
    n = min(C.shape)
    rows, cols = [], []
    for _ in range(n):
        r, c = np.unravel_index(np.argmin(C), C.shape)
        rows.append(r)
        cols.append(c)
        C[r, :] = np.inf
        C[:, c] = np.inf
    return np.asarray(rows), np.asarray(cols)


# ----------------------------------------------------------------------------
# Matcher
# ----------------------------------------------------------------------------
class AuxHungarianMatcherJAX:
    def __init__(self, cost_class=1.0, cost_mask=1.0, cost_dice=1.0,
                 num_points=128, num_new_ins=8):
        assert cost_class != 0 or cost_mask != 0 or cost_dice != 0
        self.cost_class = float(cost_class)
        self.cost_mask = float(cost_mask)
        self.cost_dice = float(cost_dice)
        self.num_points = int(num_points)
        self.num_new_ins = int(num_new_ins)

    def __call__(self, outputs, targets, prev_frame_indices, rng_key):
        pred_logits = outputs["pred_logits"]          # (B, Q, num_classes)
        pred_masks = outputs["pred_masks"]            # (B, Q, H, W)
        out_prob = jax.nn.softmax(pred_logits, axis=-1)
        B, Q, H, W = pred_masks.shape

        old_src_i = np.asarray(prev_frame_indices[0])
        old_tgt_i = np.asarray(prev_frame_indices[1])

        # ---- host-side per-image metadata (new_inst / true M) -------------
        new_inst_list, M_list, need_match = [], [], []
        for b in range(B):
            valid_inst = np.asarray(targets[b]["valid_inst"])      # (M,) bool
            new_inst = np.zeros_like(valid_inst, dtype=bool)
            new_inst[valid_inst] = True
            new_inst[old_tgt_i] = False
            new_inst_list.append(new_inst)
            M_list.append(int(valid_inst.shape[0]))
            need_match.append(bool(np.any(new_inst)))

        # ---- build padded, batched device inputs (single kernel launch) ---
        Mp = _M_PAD
        keys = jax.random.split(rng_key, B)
        coords = jax.vmap(lambda k: jax.random.uniform(
            k, (self.num_points, 2)))(keys)                        # (B, P, 2)

        out_mask_pts = jax.vmap(point_sample_jax)(pred_masks, coords)  # (B, Q, P)

        tgt_masks_padded = jnp.zeros((B, Mp, H, W), dtype=pred_masks.dtype)
        tgt_ids_padded = np.zeros((B, 1, Mp), dtype=np.int32)
        ni_padded = np.zeros((B, 1, Mp), dtype=np.float32)   # pad -> 0 -> 1e6 sentinel
        for b in range(B):
            Mb = M_list[b]
            tgt_masks_padded = tgt_masks_padded.at[b, :Mb].set(
                jnp.asarray(targets[b]["masks"], dtype=pred_masks.dtype))
            tgt_ids_padded[b, 0, :Mb] = np.asarray(targets[b]["labels"],
                                                   dtype=np.int32)
            ni_padded[b, 0, :Mb] = new_inst_list[b].astype(np.float32)

        tgt_mask_pts = jax.vmap(point_sample_jax)(tgt_masks_padded, coords)  # (B, Mp, P)

        # TODO(synk): at production num_points (e.g. 12544) feed the mask
        # operands as bf16 and tile P as a grid reduction axis; at P=128 f32
        # whole-block is already well under VMEM on v5e/v6e/v7x.
        C_all = compute_cost_matrices(
            out_mask_pts.astype(jnp.float32),
            tgt_mask_pts.astype(jnp.float32),
            out_prob.astype(jnp.float32),
            jnp.asarray(tgt_ids_padded),
            jnp.asarray(ni_padded),
            self.cost_class, self.cost_mask, self.cost_dice, self.num_new_ins)

        # single blocking device->host transfer for the whole batch
        C_all_np = np.asarray(jax.block_until_ready(C_all))

        # ---- host-side Hungarian solves ------------------------------------
        indices = []
        for b in range(B):
            new_inst = new_inst_list[b]
            if not need_match[b]:
                indices.append((old_src_i, old_tgt_i))
                continue
            Mb = M_list[b]
            C_np = C_all_np[b, :, :Mb]          # slice off padded columns
            src_i, tgt_i = _hungarian(C_np)
            sorted_idx = np.argsort(tgt_i)
            src_i, tgt_i = src_i[sorted_idx], tgt_i[sorted_idx]
            if len(src_i) == len(new_inst):
                new_tgt_i = tgt_i[new_inst]
                new_src_i = src_i[new_inst]
            else:
                tgt_i_is_new = new_inst[tgt_i]
                new_tgt_i = tgt_i[tgt_i_is_new]
                new_src_i = src_i[tgt_i_is_new]
            assert np.all(new_src_i >= Q - self.num_new_ins)
            all_src_i = np.concatenate((old_src_i, new_src_i), axis=0)
            all_tgt_i = np.concatenate((old_tgt_i, new_tgt_i), axis=0)
            indices.append((all_src_i, all_tgt_i))

        return [(jnp.asarray(i, dtype=jnp.int32), jnp.asarray(j, dtype=jnp.int32))
                for i, j in indices]


# ----------------------------------------------------------------------------
if __name__ == "__main__":
    B, Q, NUM_CLASSES, H, W = 2, 16, 6, 16, 16
    M = 8                # targets per image
    NUM_POINTS = 128
    NUM_NEW_INS = 8

    key = jax.random.PRNGKey(0)
    k_logits, k_masks, k_tmask, k_labels, k_points = jax.random.split(key, 5)

    outputs = {
        "pred_logits": jax.random.normal(k_logits, (B, Q, NUM_CLASSES), jnp.float32),
        "pred_masks": jax.random.normal(k_masks, (B, Q, H, W), jnp.float32),
    }

    tgt_masks = (jax.random.uniform(k_tmask, (B, M, H, W)) > 0.5).astype(jnp.float32)
    tgt_labels = jax.random.randint(k_labels, (B, M), 0, NUM_CLASSES - 1)
    valid = [np.array([True, True, True, True, True, True, False, False]),
             np.array([True] * M)]
    targets = [
        {"labels": tgt_labels[b], "masks": tgt_masks[b], "valid_inst": valid[b]}
        for b in range(B)
    ]

    # previously matched (src query, tgt instance) pairs, shared across batch
    prev_frame_indices = (np.array([2, 5], dtype=np.int64),
                          np.array([0, 3], dtype=np.int64))

    matcher = AuxHungarianMatcherJAX(cost_class=1.0, cost_mask=1.0, cost_dice=1.0,
                                     num_points=NUM_POINTS, num_new_ins=NUM_NEW_INS)
    result = matcher(outputs, targets, prev_frame_indices, k_points)

    for src, tgt in result:
        jax.block_until_ready(src)
        jax.block_until_ready(tgt)

    print("KERNEL_OK")
</pallas_src>

<mosaic_0001>
module attributes {stable_mosaic.version = 11 : i64} {
  func.func @kernel(%arg0: i32, %arg1: memref<1x16x128xf32, #tpu.memory_space<vmem>>, %arg2: memref<1x128x128xf32, #tpu.memory_space<vmem>>, %arg3: memref<1x16x6xf32, #tpu.memory_space<vmem>>, %arg4: memref<1x1x128xi32, #tpu.memory_space<vmem>>, %arg5: memref<1x1x128xf32, #tpu.memory_space<vmem>>, %arg6: memref<1x16x128xf32, #tpu.memory_space<vmem>>) attributes {dimension_semantics = [#tpu.dimension_semantics<parallel>], iteration_bounds = array<i64: 2>, scalar_prefetch = 0 : i64, scratch_operands = 0 : i64, tpu.core_type = #tpu.core_type<tc>, window_params = [{transform_indices = @transform_0, window_bounds = array<i64: 1, 16, 128>}, {transform_indices = @transform_1, window_bounds = array<i64: 1, 128, 128>}, {transform_indices = @transform_2, window_bounds = array<i64: 1, 16, 6>}, {transform_indices = @transform_3, window_bounds = array<i64: 1, 1, 128>}, {transform_indices = @transform_4, window_bounds = array<i64: 1, 1, 128>}, {transform_indices = @transform_5, window_bounds = array<i64: 1, 16, 128>}]} {
    %c0 = arith.constant 0 : index
    %c0_0 = arith.constant 0 : index
    %c0_1 = arith.constant 0 : index
    %0 = vector.load %arg1[%c0, %c0_0, %c0_1] : memref<1x16x128xf32, #tpu.memory_space<vmem>>, vector<1x16x128xf32>
    %1 = vector.shape_cast %0 : vector<1x16x128xf32> to vector<16x128xf32>
    %c0_2 = arith.constant 0 : index
    %c0_3 = arith.constant 0 : index
    %c0_4 = arith.constant 0 : index
    %2 = vector.load %arg2[%c0_2, %c0_3, %c0_4] : memref<1x128x128xf32, #tpu.memory_space<vmem>>, vector<1x128x128xf32>
    %3 = vector.shape_cast %2 : vector<1x128x128xf32> to vector<128x128xf32>
    %c0_5 = arith.constant 0 : index
    %c0_6 = arith.constant 0 : index
    %c0_7 = arith.constant 0 : index
    %4 = vector.load %arg3[%c0_5, %c0_6, %c0_7] : memref<1x16x6xf32, #tpu.memory_space<vmem>>, vector<1x16x6xf32>
    %5 = vector.shape_cast %4 : vector<1x16x6xf32> to vector<16x6xf32>
    %c0_8 = arith.constant 0 : index
    %c0_9 = arith.constant 0 : index
    %c0_10 = arith.constant 0 : index
    %6 = vector.load %arg4[%c0_8, %c0_9, %c0_10] : memref<1x1x128xi32, #tpu.memory_space<vmem>>, vector<1x1x128xi32>
    %7 = vector.shape_cast %6 : vector<1x1x128xi32> to vector<1x128xi32>
    %c0_11 = arith.constant 0 : index
    %c0_12 = arith.constant 0 : index
    %c0_13 = arith.constant 0 : index
    %8 = vector.load %arg5[%c0_11, %c0_12, %c0_13] : memref<1x1x128xf32, #tpu.memory_space<vmem>>, vector<1x1x128xf32>
    %9 = vector.shape_cast %8 : vector<1x1x128xf32> to vector<1x128xf32>
    %10 = arith.negf %1 : vector<16x128xf32>
    %11 = math.exp %10 : vector<16x128xf32>
    %cst = arith.constant 1.000000e+00 : f32
    %12 = vector.broadcast %cst : f32 to vector<16x128xf32>
    %13 = arith.addf %12, %11 : vector<16x128xf32>
    %14 = arith.divf %12, %13 : vector<16x128xf32>
    %cst_14 = arith.constant 1.500000e+01 : f32
    %15 = vector.broadcast %cst_14 : f32 to vector<16x128xf32>
    %16 = arith.cmpf ogt, %1, %15 : vector<16x128xf32>
    %cst_15 = arith.constant 0.000000e+00 : f32
    %17 = vector.broadcast %cst_15 : f32 to vector<16x128xf32>
    %18 = arith.subf %17, %14 : vector<16x128xf32>
    %19 = math.log1p %18 : vector<16x128xf32>
    %cst_16 = arith.constant 0.000000e+00 : f32
    %20 = vector.broadcast %cst_16 : f32 to vector<16x128xf32>
    %21 = arith.subf %20, %19 : vector<16x128xf32>
    %22 = arith.select %16, %1, %21 : vector<16x128xi1>, vector<16x128xf32>
    %cst_17 = arith.constant 0.000000e+00 : f32
    %23 = vector.broadcast %cst_17 : f32 to vector<16x128xf32>
    %24 = arith.subf %23, %1 : vector<16x128xf32>
    %cst_18 = arith.constant 2.000000e+00 : f32
    %25 = vector.broadcast %cst_18 : f32 to vector<16x128xf32>
    %26 = arith.mulf %25, %14 : vector<16x128xf32>
    %27 = tpu.concatenate %24, %26 in 0 : vector<16x128xf32>, vector<16x128xf32> -> vector<32x128xf32>
    %cst_19 = arith.constant dense<0.000000e+00> : vector<32x128xf32>
    %28 = tpu.matmul %27, %3, %cst_19 {dimension_numbers = #tpu.dot_dimension_numbers<[1], [1], [0], [0], [0, 0, 1, 0], [], []>} : vector<32x128xf32>, vector<128x128xf32>, vector<32x128xf32> -> vector<32x128xf32>
    %29 = vector.extract_strided_slice %28 {offsets = [0, 0], sizes = [16, 128], strides = [1, 1]} : vector<32x128xf32> to vector<16x128xf32>
    %30 = vector.extract_strided_slice %28 {offsets = [16, 0], sizes = [16, 128], strides = [1, 1]} : vector<32x128xf32> to vector<16x128xf32>
    %cst_20 = arith.constant dense<0.000000e+00> : vector<16xf32>
    %31 = vector.multi_reduction <add>, %22, %cst_20 [1] : vector<16x128xf32> to vector<16xf32>
    %32 = vector.shape_cast %31 : vector<16xf32> to vector<16x1xf32>
    %33 = vector.broadcast %32 : vector<16x1xf32> to vector<16x128xf32>
    %34 = arith.addf %29, %33 : vector<16x128xf32>
    %cst_21 = arith.constant 1.280000e+02 : f32
    %35 = vector.broadcast %cst_21 : f32 to vector<16x128xf32>
    %36 = arith.divf %34, %35 : vector<16x128xf32>
    %cst_22 = arith.constant dense<0.000000e+00> : vector<16xf32>
    %37 = vector.multi_reduction <add>, %14, %cst_22 [1] : vector<16x128xf32> to vector<16xf32>
    %38 = vector.shape_cast %37 : vector<16xf32> to vector<16x1xf32>
    %cst_23 = arith.constant dense<0.000000e+00> : vector<128xf32>
    %39 = vector.multi_reduction <add>, %3, %cst_23 [1] : vector<128x128xf32> to vector<128xf32>
    %40 = vector.shape_cast %39 : vector<128xf32> to vector<1x128xf32>
    %41 = vector.broadcast %38 : vector<16x1xf32> to vector<16x128xf32>
    %42 = vector.broadcast %40 : vector<1x128xf32> to vector<16x128xf32>
    %43 = arith.addf %41, %42 : vector<16x128xf32>
    %cst_24 = arith.constant 1.000000e+00 : f32
    %44 = vector.broadcast %cst_24 : f32 to vector<16x128xf32>
    %45 = arith.addf %30, %44 : vector<16x128xf32>
    %cst_25 = arith.constant 1.000000e+00 : f32
    %46 = vector.broadcast %cst_25 : f32 to vector<16x128xf32>
    %47 = arith.addf %43, %46 : vector<16x128xf32>
    %48 = arith.divf %45, %47 : vector<16x128xf32>
    %cst_26 = arith.constant 1.000000e+00 : f32
    %49 = vector.broadcast %cst_26 : f32 to vector<16x128xf32>
    %50 = arith.subf %49, %48 : vector<16x128xf32>
    %51 = tpu.iota {dimensions = array<i32: 0>} : vector<6x128xi32>
    %52 = vector.broadcast %7 : vector<1x128xi32> to vector<6x128xi32>
    %53 = arith.cmpi eq, %51, %52 : vector<6x128xi32>
    %54 = arith.extui %53 : vector<6x128xi1> to vector<6x128xi32>
    %55 = arith.sitofp %54 : vector<6x128xi32> to vector<6x128xf32>
    %cst_27 = arith.constant dense<0.000000e+00> : vector<16x128xf32>
    %56 = tpu.matmul %5, %55, %cst_27 {dimension_numbers = #tpu.dot_dimension_numbers<[1], [0], [0], [1], [0, 0, 1, 1], [], []>} : vector<16x6xf32>, vector<6x128xf32>, vector<16x128xf32> -> vector<16x128xf32>
    %cst_28 = arith.constant 0.000000e+00 : f32
    %57 = vector.broadcast %cst_28 : f32 to vector<16x128xf32>
    %58 = arith.subf %57, %56 : vector<16x128xf32>
    %cst_29 = arith.constant 1.000000e+00 : f32
    %59 = vector.broadcast %cst_29 : f32 to vector<16x128xf32>
    %60 = arith.mulf %59, %36 : vector<16x128xf32>
    %cst_30 = arith.constant 1.000000e+00 : f32
    %61 = vector.broadcast %cst_30 : f32 to vector<16x128xf32>
    %62 = arith.mulf %61, %58 : vector<16x128xf32>
    %63 = arith.addf %60, %62 : vector<16x128xf32>
    %cst_31 = arith.constant 1.000000e+00 : f32
    %64 = vector.broadcast %cst_31 : f32 to vector<16x128xf32>
    %65 = arith.mulf %64, %50 : vector<16x128xf32>
    %66 = arith.addf %63, %65 : vector<16x128xf32>
    %67 = tpu.iota {dimensions = array<i32: 0>} : vector<16x128xi32>
    %cst_32 = arith.constant 5.000000e-01 : f32
    %68 = vector.broadcast %cst_32 : f32 to vector<1x128xf32>
    %69 = arith.cmpf ogt, %9, %68 : vector<1x128xf32>
    %c8_i32 = arith.constant 8 : i32
    %70 = vector.broadcast %c8_i32 : i32 to vector<16x128xi32>
    %71 = arith.cmpi sge, %67, %70 : vector<16x128xi32>
    %72 = vector.broadcast %69 : vector<1x128xi1> to vector<16x128xi1>
    %73 = arith.andi %72, %71 : vector<16x128xi1>
    %cst_33 = arith.constant 1.000000e+06 : f32
    %74 = vector.broadcast %cst_33 : f32 to vector<16x128xf32>
    %75 = arith.select %73, %66, %74 : vector<16x128xi1>, vector<16x128xf32>
    %c0_34 = arith.constant 0 : index
    %c0_35 = arith.constant 0 : index
    %c0_36 = arith.constant 0 : index
    %76 = vector.load %arg6[%c0_34, %c0_35, %c0_36] : memref<1x16x128xf32, #tpu.memory_space<vmem>>, vector<1x16x128xf32>
    %77 = vector.shape_cast %76 : vector<1x16x128xf32> to vector<16x128xf32>
    %78 = vector.shape_cast %75 : vector<16x128xf32> to vector<1x16x128xf32>
    tpu.vector_store %arg6[%c0_34, %c0_35, %c0_36], %78 {strides = array<i32>} : memref<1x16x128xf32, #tpu.memory_space<vmem>>, vector<1x16x128xf32>,
    return
  }
  func.func @transform_0(%arg0: i32) -> (i32, i32, i32) {
    %c0_i32 = arith.constant 0 : i32
    %c0_i32_0 = arith.constant 0 : i32
    %c0_i32_1 = arith.constant 0 : i32
    return %arg0, %c0_i32, %c0_i32_0 : i32, i32, i32
  }
  func.func @transform_1(%arg0: i32) -> (i32, i32, i32) {
    %c0_i32 = arith.constant 0 : i32
    %c0_i32_0 = arith.constant 0 : i32
    %c0_i32_1 = arith.constant 0 : i32
    return %arg0, %c0_i32, %c0_i32_0 : i32, i32, i32
  }
  func.func @transform_2(%arg0: i32) -> (i32, i32, i32) {
    %c0_i32 = arith.constant 0 : i32
    %c0_i32_0 = arith.constant 0 : i32
    %c0_i32_1 = arith.constant 0 : i32
    return %arg0, %c0_i32, %c0_i32_0 : i32, i32, i32
  }
  func.func @transform_3(%arg0: i32) -> (i32, i32, i32) {
    %c0_i32 = arith.constant 0 : i32
    %c0_i32_0 = arith.constant 0 : i32
    %c0_i32_1 = arith.constant 0 : i32
    return %arg0, %c0_i32, %c0_i32_0 : i32, i32, i32
  }
  func.func @transform_4(%arg0: i32) -> (i32, i32, i32) {
    %c0_i32 = arith.constant 0 : i32
    %c0_i32_0 = arith.constant 0 : i32
    %c0_i32_1 = arith.constant 0 : i32
    return %arg0, %c0_i32, %c0_i32_0 : i32, i32, i32
  }
  func.func @transform_5(%arg0: i32) -> (i32, i32, i32) {
    %c0_i32 = arith.constant 0 : i32
    %c0_i32_0 = arith.constant 0 : i32
    %c0_i32_1 = arith.constant 0 : i32
    return %arg0, %c0_i32, %c0_i32_0 : i32, i32, i32
  }
}

</mosaic_0001>

<bundles_post_ra>
// kernel: tpu_custom_call.1
= control target key start
LH: loop header
LB: loop body
LE: loop exit
PB: predicated region body
PF: predicated region fallthrough
CT: control target
= control target key end

     0   :  { %10 = vsyncpa [#allocation3], 0  ;;  %s1488_s0 = inlined_call_operand.vmem [shape: f32[2,16,128], index: 0, kind: input, shape index: {}]   ;;  %s1489_s1 = inlined_call_operand.hbm [shape: f32[2,128,128], index: 1, kind: input, shape index: {}]   ;;  %s1490_s2 = inlined_call_operand.vmem [shape: f32[2,16,6], index: 2, kind: input, shape index: {}]   ;;  %s1491_s3 = inlined_call_operand.vmem [shape: s32[2,1,128], index: 3, kind: input, shape index: {}]   ;;  %s1492_s4 = inlined_call_operand.vmem [shape: f32[2,1,128], index: 4, kind: input, shape index: {}]   ;;  %s1493_s5 = inlined_call_operand.hbm [shape: f32[2,16,128], index: 5, kind: output, shape index: {}]  }
   0x1   :  { %12 = vsyncpa [#allocation3 + $0x1], 0 }
   0x2   :  { %13 = vsyncpa [#allocation4], 0 }
   0x3   :  { %15 = vsyncpa [#allocation4 + $0x1], 0  ;;  %s1232_s18 = smov 0   ;;  %s1234_s19 = smov 0  }
   0x4   :  { %s1236_s20 = smov 0   ;;  %s1238_s21 = smov 0  }
   0x5 LB: > { %s1253_s22 = sadd.s32 4294967295, %s1191_s21   ;;  %s903_s23 = sadd.s32 4294967294, %s1191_s21   ;;  %s1191_s21 = sphi %s1238_s21, %s1506_s21   ;;  %s1187_s20 = sphi %s1236_s20, %s1505_s20   ;;  %s1183_s19 = sphi %s1234_s19, %s1504_s19   ;;  %s1179_s18 = sphi %s1232_s18, %s1503_s18  }
   0x6   : > { %s1257_s24 = sadd.s32 1, %s1191_s21   ;;  %s54_s25 = sadd.s32 1, %s1187_s20 }
   0x7   : > { %s51_s26 = ssub.s32 %s1191_s21, %s1257_s24  ;;  %p61_p0 = scmp.ne.s32.totalorder %s1187_s20, %s1183_s19 }
   0x8   : > { %p52_p1 = scmp.eq.s32.totalorder %s51_s26, 0  ;;  %p62_p2 = scmp.eq.s32.totalorder %s1191_s21, 0 }
   0x9   : > { %p67_p3 = scmp.ne.s32.totalorder %s1183_s19, %s1179_s18  ;;  %p68_p4 = scmp.eq.s32.totalorder %s1253_s22, 0 }
   0xa   : > { %s1269_s27 = scalar_select %p52_p1, %s1187_s20, %s54_s25  }
   0xb   : > { %p1271_p5 = por %p62_p2, %p61_p0  ;;  %p1275_p6 = por %p68_p4, %p67_p3 }
   0xc   : > { %p169_p7 = scmp.eq.s32.totalorder %s1253_s22, 1  ;;  %p175_p8 = scmp.eq.s32.totalorder %s903_s23, 1 }
   0xd   : > { %p1042_p10 = scmp.lt.s32.totalorder %s1191_s21, 2  ;;  %s203_s7 = sand.u32 1, %s1187_s20  }
   0xe   : > { %p1282_p11 = por %p169_p7, %p61_p0  ;;  %p1286_p12 = por %p175_p8, %p67_p3 }
   0xf   : > { %s928_s8 = sshll.u32 %s1191_s21, 11  ;;  %s906_s9 = sshll.u32 %s203_s7, 7 }
  0x10   : > { %s1497_s30 = scalar_select %p1282_p11, 1, 0 }
  0x11   : > { %s1498_s6 = scalar_select %p1286_p12, 1, 0 }
  0x12   : > { %s1295_s12 = scalar_lea.hbm %s1489_s1, %s928_s8  ;;  %s207_s13 = scalar_lea.vmem [#allocation2], %s906_s9 }
  0x13   : > { %s214_s14 = sshll.u32 %s207_s13, 4  ;;  %p1299_p13 = pnand %p1042_p10, %p1271_p5  ;;  %s1303_s14 = int_to_ptr.vmem [resolvable:$true] %s214_s14 }
  0x14   : > { %s1305_s16 = scalar_lea.sflag [#allocation3], %s203_s7  ;;  %s1095_s17 = scalar_lea.hbm %s1295_s12, 2048 }
  0x15   : > { %p1096_p0 = scmp.ne.s32.totalorder %s1295_s12, %s1095_s17  ;;  %p1097_p1 = pneg %p1299_p13 }
  0x16   : > { %s1100_s26 = scalar_lea.hbm %s1489_s1, 4096  ;;  %p1101_p4 = scmp.lt.u32.totalorder %s1295_s12, %s1489_s1 }
  0x17   : > { %p1098_p2 = pnand %p1097_p1, %p1096_p0  ;;  %p1102_p5 = scmp.lt.u32.totalorder %s1100_s26, %s1095_s17 }
  0x18   : > { %p1104_p8 = scmp.lt.u32.totalorder %s1095_s17, %s1295_s12 }
  0x19   : > { %p1099_p3 = pneg %p1098_p2  ;;  %p1103_p7 = por %p1102_p5, %p1101_p4 }
  0x1b   : > { %p1105_p10 = por %p1104_p8, %p1103_p7 }
  0x1d   : > { %p1106_p9 = pnand %p1105_p10, %p1099_p3 }
  0x1f   : > { %1109 = shalt.err (!%p1106_p9)
}
  0x20   : > { %s1110_s7 = scalar_lea.vmem %s1303_s14, 2048  ;;  %s1193_s9 = smov [#allocation2]  }
  0x21   : > { %p1111_p0 = scmp.ne.s32.totalorder %s1303_s14, %s1110_s7  ;;  %s1115_s10 = sshll.u32 %s1193_s9, 4  ;;  %s1116_s10 = int_to_ptr.vmem [resolvable:$false] %s1115_s10 }
  0x22   : > { %s1117_s11 = scalar_lea.vmem %s1116_s10, 4096  ;;  %p1118_p11 = scmp.lt.s32.totalorder %s1303_s14, %s1116_s10 }
  0x23   : > { %p1113_p2 = pnand %p1111_p0, %p1097_p1  ;;  %p1119_p4 = scmp.lt.s32.totalorder %s1117_s11, %s1110_s7 }
  0x25   : > { %p1114_p12 = pneg %p1113_p2  ;;  %p1120_p5 = por %p1119_p4, %p1118_p11 }
  0x27   : > { %p1121_p7 = pnand %p1120_p5, %p1114_p12 }
  0x29   : > { %1124 = shalt.err (!%p1121_p7)
}
  0x2a   : > { %s1194_s13 = smov 128   ;;  %s1195_s17 = smov 8  }
  0x2b   : > { %1037 = dma.hbm_to_vmem [thread:$0]  (!%p1299_p13), %s1295_s12, 2048, %s1303_s14, %s1305_s16, %s1194_s13, %s1194_s13, %s1195_s17  }
  0x2c   : > { %p909_p9 = scmp.ge.s32.totalorder %s1191_s21, 1  ;;  %p242_p1 = scmp.lt.s32.totalorder %s1191_s21, 3 }
  0x2e   : > { %p243_p3 = pnand %p909_p9, %p242_p1 }
  0x2f   : > { %s1336_s23 = sand.u32 (!%p243_p3), 1, %s1183_s19  }
  0x30   : > { %246 = sbr.rel (%p243_p3) target bundleno = 363 (0x16b), region = 40  ;;  %s910_s25 = sshll.u32 (!%p243_p3), %s1336_s23, 7 }
  0x31   : > { %s249_s26 = scalar_lea.sflag (!%p243_p3), [#allocation3], %s1336_s23  ;;  %s1340_s28 = scalar_lea.vmem (!%p243_p3), [#allocation2], %s910_s25 }
  0x37   : > { %1170 = dma.done.wait (%p1275_p6), %s249_s26, 2048  }
  0x38   : > { %1172 = vsyncadd (%p1275_p6), %s249_s26, 4294965248  ;;  %p295_p11 = scmp.lt.s32.totalorder %s1253_s22, 1  ;;  %v313_v0 = vld [vmem:[%s1340_s28] sm:$0xff]  ;;  %v314_v1 = vld [vmem:[%s1340_s28 + $0x8] sm:$0xff]  ;;  %v521_v3 = vlaneseq  ;;  %vm666_vm0 = vcmask 48128   ;;  %vm673_vm1 = vcmask 1045504  }
  0x39   : > { %v315_v2 = vld [vmem:[%s1340_s28 + $0x10] sm:$0xff]  ;;  %v998_v4 = vpack.c.bf16 %v314_v1, %v313_v0  ;;  %v316_v5 = vld [vmem:[%s1340_s28 + $0x18] sm:$0xff]  ;;  %473 = vadd.xlane.f32.xlu0 %v313_v0  ;;  %v317_v10 = vld [vmem:[%s1340_s28 + $0x20] sm:$0xff]  ;;  %v1196_v17 = vmov 0.0   ;;  %s911_s17 = sshll.u32 %s1336_s23, 4  ;;  %vm532_vm5 = vcmask 130112  }
  0x3a   : > { %s1348_s12 = scalar_select %p295_p11, %s1253_s22, 1  ;;  %477 = vadd.xlane.f32.xlu1 %v315_v2  ;;  %v1002_v6 = vpack.c.bf16 %v316_v5, %v315_v2  ;;  %v1366_v7 = vshrl.u32 %v521_v3, 7  ;;  %v318_v11 = vld [vmem:[%s1340_s28 + $0x28] sm:$0xff]  ;;  %v319_v20 = vld [vmem:[%s1340_s28 + $0x30] sm:$0xff]  ;;  %v320_v21 = vld [vmem:[%s1340_s28 + $0x38] sm:$0xff]  ;;  %v1394_v57 = vand.u32 127, %v521_v3 }
  0x3b   : > { %999 = vmatprep.subr.bf16.mxu0 %v998_v4  ;;  %v1006_v16 = vpack.c.bf16 %v318_v11, %v317_v10  ;;  %v321_v22 = vld [vmem:[%s1340_s28 + $0x40] sm:$0xff]  ;;  %v1010_v23 = vpack.c.bf16 %v320_v21, %v319_v20  ;;  %v322_v24 = vld [vmem:[%s1340_s28 + $0x48] sm:$0xff]  ;;  %v323_v26 = vld [vmem:[%s1340_s28 + $0x50] sm:$0xff]  ;;  %s1390_s25 = scalar_lea.vmem [#allocation5], %s911_s17  ;;  %v1197_v56 = vmov 1000000.0  }
  0x3c   : > { %s929_s14 = sshll.u32 %s1348_s12, 4  ;;  %1001 = vmatpush3.bf16.xpose.msra.mxu0 %v998_v4  ;;  %s307_s13 = scalar_lea.vmem %s1491_s3, %s1348_s12  ;;  %v324_v28 = vld [vmem:[%s1340_s28 + $0x58] sm:$0xff]  ;;  %v325_v29 = vld [vmem:[%s1340_s28 + $0x60] sm:$0xff]  ;;  %v1014_v30 = vpack.c.bf16 %v322_v24, %v321_v22  ;;  %v326_v31 = vld [vmem:[%s1340_s28 + $0x68] sm:$0xff]  ;;  %772 = vst [vmem:[%s1390_s25] sm:$0xff] %v1197_v56  ;;  %v527_v58 = vadd.s32 4294967288, %v1394_v57  ;;  %v534_v60 = vadd.s32 4294967280, %v1394_v57  ;;  %v525_v61 = vsub.s32 %v1394_v57, %v1366_v7 }
  0x3d   : > { %s299_s16 = scalar_lea.vmem %s1488_s0, %s929_s14  ;;  %s304_s9 = scalar_lea.vmem %s1490_s2, %s929_s14  ;;  %1003 = vmatprep.subr.bf16.mxu0 %v1002_v6  ;;  %475 = vadd.xlane.f32.xlu0 %v314_v1  ;;  %v918_v15 = vld [vmem:[%s307_s13] ss:$0 sm:$0xff]  ;;  %v327_v32 = vld [vmem:[%s1340_s28 + $0x70] sm:$0xff]  ;;  %v328_v33 = vld [vmem:[%s1340_s28 + $0x78] sm:$0xff]  ;;  %v1018_v36 = vpack.c.bf16 %v324_v28, %v323_v26  ;;  %v1022_v40 = vpack.c.bf16 %v326_v31, %v325_v29  ;;  %v541_v0 = vadd.s32 4294967272, %v1394_v57  ;;  %v548_v3 = vadd.s32 4294967264, %v1394_v57 }
  0x3e   : > { %v311_v8 = vld [vmem:[%s299_s16] sm:$0xff]  ;;  %v1368_v9 = vld [vmem:[%s299_s16 + $0x8] sm:$0xff]  ;;  %479 = vadd.xlane.f32.xlu1 %v316_v5  ;;  %vm663_vm2 = vcmp.eq.s32.totalorder %v1366_v7, %v918_v15  ;;  %v1026_v48 = vpack.c.bf16 %v328_v33, %v327_v32  ;;  %v530_v62 = vsub.s32 %v527_v58, %v1366_v7  ;;  %v537_v1 = vsub.s32 %v534_v60, %v1366_v7  ;;  %s310_s14 = scalar_lea.vmem %s1492_s4, %s1348_s12  ;;  %s788_s12 = sshll.u32 %s1390_s25, 4  ;;  %s1438_s12 = int_to_ptr.vmem [resolvable:$true] %s788_s12 }
  0x3f   : > { %v917_v12 = vmul.f32 -1.442695, %v1368_v9  ;;  %v371_v13 = vsub.f32 0.0, %v311_v8  ;;  %v329_v14 = vld [vmem:[%s304_s9] sm:$0xff]  ;;  %v919_v18 = vsel %vm663_vm2, 1.0, %v1196_v17  ;;  %v330_v19 = vld [vmem:[%s304_s9 + $0x8] sm:$0xff] }
  0x40   : > { %995 = vmatprep.mubr.msk.f32.mxu1 %vm666_vm0, %v329_v14  ;;  %993 = vmatprep.subr.msk.mxu1 %vm673_vm1, %v919_v18  ;;  %v916_v34 = vmul.f32 -1.442695, %v311_v8  ;;  %vm346_vm4 = vcmp.gt.f32.partialorder %v1368_v9, 15.0  ;;  %v372_v53 = vsub.f32 0.0, %v1368_v9  ;;  %vm539_vm6 = vcmask 195712   ;;  %s931_s29 = sshll.u32 %s1253_s22, 8 }
  0x41   : > { %987 = vmatprep.mubr.f32.mxu0 %v371_v13  ;;  %1083 = vpow2.f32 %v917_v12  ;;  %481 = vadd.xlane.f32.xlu0 %v317_v10  ;;  %v551_v12 = vsub.s32 %v548_v3, %v1366_v7  ;;  %vm546_vm7 = vcmask 261312   ;;  %v562_v17 = vadd.s32 4294967248, %v1394_v57  ;;  %s1443_s8 = scalar_lea.hbm %s1493_s5, %s931_s29  ;;  %s775_s7 = scalar_lea.sflag [#allocation4], %s1336_s23 }
  0x42   : > { %483 = vadd.xlane.f32.xlu1 %v318_v11  ;;  %994 = vmatpush3.msk.msra.mxu1 %vm673_vm1, %v919_v18  ;;  %v555_v11 = vadd.s32 4294967256, %v1394_v57  ;;  %vm553_vm8 = vcmask 326912   ;;  %vm560_vm9 = vcmask 392512   ;;  %vm567_vm10 = vcmask 458112   ;;  %s1125_s9 = scalar_lea.vmem %s1438_s12, 256  ;;  %p1500_p12 = scmp.ne.s32.totalorder %s1497_s30, 0 }
  0x43   : > { %996 = vmatmul.mubr.msk.f32.vlgmr.msra.gmra.mrb[0].mxu1 %vm666_vm0, %v330_v19  ;;  %vm574_vm11 = vcmask 523712   ;;  %vm581_vm12 = vcmask 589312   ;;  %vm588_vm13 = vcmask 654912   ;;  %vm595_vm14 = vcmask 720512   ;;  %p1126_p6 = scmp.ne.s32.totalorder %s1438_s12, %s1125_s9  ;;  %s1199_s22 = smov [#allocation5]  }
  0x44   : > { %1005 = vmatpush3.bf16.xpose.msra.mxu0 %v1002_v6  ;;  %v544_v6 = vsub.s32 %v541_v0, %v1366_v7  ;;  %v558_v19 = vsub.s32 %v555_v11, %v1366_v7  ;;  %vm602_vm15 = vcmask 786112   ;;  %vm609_vm0 = vcmask 851712   ;;  %s1129_s10 = sshll.u32 %s1199_s22, 4  ;;  %s1130_s10 = int_to_ptr.vmem [resolvable:$false] %s1129_s10 }
  0x45   : > { %1007 = vmatprep.subr.bf16.mxu0 %v1006_v16  ;;  %485 = vadd.xlane.f32.xlu0 %v319_v20  ;;  %v625_v0 = vadd.s32 4294967176, %v1394_v57  ;;  %vm616_vm1 = vcmask 917312   ;;  %vm623_vm2 = vcmask 982912   ;;  %p1127_p13 = pnand %p1126_p6, %p1500_p12  ;;  %s1131_s11 = scalar_lea.vmem %s1130_s10, 512 }
  0x46   : > { %487 = vadd.xlane.f32.xlu1 %v320_v21  ;;  %p1132_p10 = scmp.lt.s32.totalorder %s1438_s12, %s1130_s10  ;;  %p1133_p0 = scmp.lt.s32.totalorder %s1131_s11, %s1125_s9 }
  0x47   : > { %v628_v3 = vsub.s32 %v625_v0, %v1366_v7  ;;  %p1128_p8 = pneg %p1127_p13 }
  0x48   : > { %p1134_p2 = por %p1133_p0, %p1132_p10 }
  0x49   : > { %489 = vadd.xlane.f32.xlu0 %v321_v22 }
  0x4a   : > { %491 = vadd.xlane.f32.xlu1 %v322_v24  ;;  %v565_v24 = vsub.s32 %v562_v17, %v1366_v7  ;;  %p1135_p4 = pnand %p1134_p2, %p1128_p8 }
  0x4b   : > { %v1084_v25 = vpop.eup %1083 }
  0x4c   : > { %1009 = vmatpush3.bf16.xpose.msra.mxu0 %v1006_v16  ;;  %v340_v27 = vadd.f32 1.0, %v1084_v25 }
  0x4d   : > { %1011 = vmatprep.subr.bf16.mxu0 %v1010_v23  ;;  %493 = vadd.xlane.f32.xlu0 %v323_v26 }
  0x4e   : > { %1085 = vrcp.f32 %v340_v27  ;;  %495 = vadd.xlane.f32.xlu1 %v324_v28  ;;  %v576_v28 = vadd.s32 4294967232, %v1394_v57 }
  0x4f   : > { %1087 = vpow2.f32 %v916_v34 }
  0x50   : > { %v579_v34 = vsub.s32 %v576_v28, %v1366_v7 }
  0x51   : > { %497 = vadd.xlane.f32.xlu0 %v325_v29 }
  0x52   : > { %499 = vadd.xlane.f32.xlu1 %v326_v31 }
  0x54   : > { %1013 = vmatpush3.bf16.xpose.msra.mxu0 %v1010_v23  ;;  %v569_v23 = vadd.s32 4294967240, %v1394_v57 }
  0x55   : > { %1015 = vmatprep.subr.bf16.mxu0 %v1014_v30  ;;  %501 = vadd.xlane.f32.xlu0 %v327_v32 }
  0x56   : > { %503 = vadd.xlane.f32.xlu1 %v328_v33  ;;  %v572_v29 = vsub.s32 %v569_v23, %v1366_v7  ;;  %v583_v33 = vadd.s32 4294967224, %v1394_v57 }
  0x58   : > { %v1086_v35 = vpop.eup %1085 }
  0x59   : > { %471 = vadd.xlane.f32.xlu0 %v1086_v35  ;;  %v348_v37 = vsub.f32 0.0, %v1086_v35  ;;  %v1088_v43 = vpop.eup %1087  ;;  %v374_v55 = vmul.f32 2.0, %v1086_v35 }
  0x5a   : > { %v339_v46 = vadd.f32 1.0, %v1088_v43  ;;  %v597_v43 = vadd.s32 4294967208, %v1394_v57 }
  0x5b   : > { %v358_v38 = vadd.f32 1.0, %v348_v37  ;;  %v361_v39 = vmul.f32 -0.5, %v348_v37  ;;  %v364_v42 = vand.u32 2147483647, %v348_v37 }
  0x5c   : > { %1017 = vmatpush3.bf16.xpose.msra.mxu0 %v1014_v30 }
  0x5d   : > { %1019 = vmatprep.subr.bf16.mxu0 %v1018_v36  ;;  %1089 = vlog2.f32 %v358_v38  ;;  %v362_v41 = vadd.f32 1.0, %v361_v39  ;;  %vm365_vm3 = vcmp.lt.f32.partialorder %v364_v42, 0.0004427343  ;;  %v590_v38 = vadd.s32 4294967216, %v1394_v57 }
  0x5e   : > { %1091 = vrcp.f32 %v339_v46  ;;  %v586_v39 = vsub.s32 %v583_v33, %v1366_v7 }
  0x5f   : > { %v363_v44 = vmul.f32 %v362_v41, %v348_v37 }
  0x64   : > { %1021 = vmatpush3.bf16.xpose.msra.mxu0 %v1018_v36 }
  0x65   : > { %1023 = vmatprep.subr.bf16.mxu0 %v1022_v40 }
  0x67   : > { %v1090_v45 = vpop.eup %1089 }
  0x68   : > { %v360_v47 = vmul.f32 0.6931472, %v1090_v45  ;;  %v1092_v52 = vpop.eup %1091 }
  0x69   : > { %v373_v54 = vmul.f32 2.0, %v1092_v52 }
  0x6a   : > { %v366_v49 = vsel %vm365_vm3, %v363_v44, %v360_v47  ;;  %v593_v44 = vsub.s32 %v590_v38, %v1366_v7  ;;  %vm630_vm3 = vcmask 1048512  }
  0x6b   : > { %v368_v50 = vsub.f32 0.0, %v366_v49  ;;  %v600_v49 = vsub.s32 %v597_v43, %v1366_v7 }
  0x6c   : > { %1025 = vmatpush3.bf16.xpose.msra.mxu0 %v1022_v40 }
  0x6d   : > { %1027 = vmatprep.subr.bf16.mxu0 %v1026_v48  ;;  %v370_v51 = vsel %vm346_vm4, %v1368_v9, %v368_v50 }
  0x6e   : > { %462 = vadd.xlane.f32.xlu1 %v370_v51 }
  0x74   : > { %1029 = vmatpush3.bf16.xpose.msra.mxu0 %v1026_v48  ;;  %v604_v48 = vadd.s32 4294967200, %v1394_v57 }
  0x7b   : > { %988 = vmatmul.mubr.f32.vlgmr.msra.gmra.mrb[0].mxu0 %v372_v53  ;;  %v611_v53 = vadd.s32 4294967192, %v1394_v57 }
  0x7c   : > { %990 = vmatprep.mubr.f32.mxu0 %v373_v54  ;;  %v607_v54 = vsub.s32 %v604_v48, %v1366_v7 }
  0x7d   : > { %v614_v60 = vsub.s32 %v611_v53, %v1366_v7 }
  0x7f   : > { %991 = vmatmul.mubr.f32.gmra.mrb[2].mxu0 %v374_v55 }
  0xc6   : > { %v474_v59 = vpop.xlane.xlu0 %473 }
  0xc7   : > { %v478_v63 = vpop.xlane.xlu1 %477  ;;  %v526_v4 = vrot.slane %v474_v59, %v525_v61  ;;  %v618_v59 = vadd.s32 4294967184, %v1394_v57 }
  0xc8   : > { %v538_v8 = vrot.slane %v478_v63, %v537_v1 }
  0xc9   : > { %v621_v1 = vsub.s32 %v618_v59, %v1366_v7 }
  0xca   : > { %v476_v2 = vpop.xlane.xlu0 %475 }
  0xcb   : > { %v531_v5 = vrot.slane %v476_v2, %v530_v62  ;;  %v480_v9 = vpop.xlane.xlu1 %479 }
  0xcc   : > { %v545_v13 = vrot.slane %v480_v9, %v544_v6 }
  0xcd   : > { %v533_v10 = vsel %vm532_vm5, %v531_v5, %v526_v4 }
  0xce   : > { %v482_v14 = vpop.xlane.xlu0 %481  ;;  %v540_v16 = vsel %vm539_vm6, %v538_v8, %v533_v10 }
  0xcf   : > { %v552_v20 = vrot.slane %v482_v14, %v551_v12  ;;  %v484_v21 = vpop.xlane.xlu1 %483  ;;  %v547_v22 = vsel %vm546_vm7, %v545_v13, %v540_v16  ;;  %v332_v16 = vld [vmem:[%s310_s14] sm:$0x1] }
  0xd0   : > { %v559_v25 = vrot.slane %v484_v21, %v558_v19  ;;  %vm759_vm4 = vcmp.gt.f32.partialorder %v332_v16, 0.5 }
  0xd1   : > { %v554_v27 = vsel %vm553_vm8, %v552_v20, %v547_v22  ;;  %v765_v22 = vsub.s32 0, %v1366_v7 }
  0xd2   : > { %v486_v26 = vpop.xlane.xlu0 %485  ;;  %v561_v32 = vsel %vm560_vm9, %v559_v25, %v554_v27 }
  0xd3   : > { %v566_v30 = vrot.slane %v486_v26, %v565_v24  ;;  %v488_v31 = vpop.xlane.xlu1 %487  ;;  %v1198_v24 = vmov 0  }
  0xd4   : > { %v573_v35 = vrot.slane %v488_v31, %v572_v29  ;;  %v762_v25 = vsel %vm759_vm4, 1, %v1198_v24 }
  0xd5   : > { %v568_v37 = vsel %vm567_vm10, %v566_v30, %v561_v32  ;;  %v766_v31 = vrot.slane %v762_v25, %v765_v22 }
  0xd6   : > { %v490_v36 = vpop.xlane.xlu0 %489  ;;  %v575_v42 = vsel %vm574_vm11, %v573_v35, %v568_v37 }
  0xd7   : > { %v580_v40 = vrot.slane %v490_v36, %v579_v34  ;;  %v492_v41 = vpop.xlane.xlu1 %491  ;;  %vm767_vm5 = vcmp.eq.s32.totalorder %v766_v31, 1 }
  0xd8   : > { %v587_v45 = vrot.slane %v492_v41, %v586_v39 }
  0xd9   : > { %v582_v47 = vsel %vm581_vm12, %v580_v40, %v575_v42 }
  0xda   : > { %v494_v46 = vpop.xlane.xlu0 %493  ;;  %v589_v52 = vsel %vm588_vm13, %v587_v45, %v582_v47 }
  0xdb   : > { %v594_v50 = vrot.slane %v494_v46, %v593_v44  ;;  %v496_v51 = vpop.xlane.xlu1 %495 }
  0xdc   : > { %v601_v55 = vrot.slane %v496_v51, %v600_v49 }
  0xdd   : > { %v596_v58 = vsel %vm595_vm14, %v594_v50, %v589_v52 }
  0xde   : > { %v498_v56 = vpop.xlane.xlu0 %497  ;;  %v603_v63 = vsel %vm602_vm15, %v601_v55, %v596_v58 }
  0xdf   : > { %v608_v61 = vrot.slane %v498_v56, %v607_v54  ;;  %v500_v62 = vpop.xlane.xlu1 %499 }
  0xe0   : > { %v615_v2 = vrot.slane %v500_v62, %v614_v60 }
  0xe1   : > { %v610_v5 = vsel %vm609_vm0, %v608_v61, %v603_v63 }
  0xe2   : > { %v502_v4 = vpop.xlane.xlu0 %501  ;;  %v617_v9 = vsel %vm616_vm1, %v615_v2, %v610_v5 }
  0xe3   : > { %v622_v6 = vrot.slane %v502_v4, %v621_v1  ;;  %v504_v8 = vpop.xlane.xlu1 %503 }
  0xe4   : > { %v629_v10 = vrot.slane %v504_v8, %v628_v3 }
  0xe5   : > { %v624_v11 = vsel %vm623_vm2, %v622_v6, %v617_v9 }
  0xe6   : > { %v631_v12 = vsel %vm630_vm3, %v629_v10, %v624_v11  ;;  %v472_v13 = vpop.xlane.xlu0 %471 }
  0xe7   : > { %v646_v14 = vadd.f32 %v631_v12, %v472_v13 }
  0xe9   : > { %v650_v57 = vadd.f32 1.0, %v646_v14 }
  0xeb   : > { %1093 = vrcp.f32 %v650_v57 }
  0xf5   : > { %v1094_v30 = vpop.eup %1093 }
  0xfb   : > { %v463_v17 = vpop.xlane.xlu1 %462 }
 0x116   : > { %v1407_v15 = vpop.f32.mrb[0].mxu1 }
 0x117   : > { %v743_v18 = vpop.f32.mrb[1].mxu1  ;;  %v753_v21 = vsub.f32 0.0, %v1407_v15 }
 0x14e   : > { %v989_v18 = vpop.f32.mrb[0].mxu0 }
 0x14f   : > { %v465_v19 = vadd.f32 %v989_v18, %v463_v17  ;;  %v441_v20 = vpop.f32.mrb[1].mxu0 }
 0x151   : > { %v468_v23 = vmul.f32 0.0078125, %v465_v19 }
 0x152   : > { %v992_v26 = vpop.f32.mrb[2].mxu0 }
 0x153   : > { %v755_v27 = vadd.f32 %v753_v21, %v468_v23  ;;  %v648_v28 = vadd.f32 1.0, %v992_v26  ;;  %v451_v29 = vpop.f32.mrb[3].mxu0 }
 0x155   : > { %v654_v32 = vmul.f32 %v1094_v30, %v648_v28 }
 0x157   : > { %v656_v33 = vsub.f32 1.0, %v654_v32 }
 0x159   : > { %v757_v7 = vadd.f32 %v755_v27, %v656_v33 }
 0x15b   : > { %v771_v15 = vsel %vm767_vm5, %v757_v7, 1000000.0 }
 0x15c   : > { %773 = vst [vmem:[%s1390_s25 + $0x8] sm:$0xff] %v771_v15 }
 0x15d   : > { %1138 = shalt.err (!%p1135_p4)
}
 0x15e   : > { %s1139_s13 = scalar_lea.hbm %s1443_s8, 256  ;;  %s1143_s26 = scalar_lea.hbm %s1493_s5, 512 }
 0x15f   : > { %p1140_p5 = scmp.ne.s32.totalorder %s1443_s8, %s1139_s13  ;;  %p1144_p1 = scmp.lt.u32.totalorder %s1443_s8, %s1493_s5 }
 0x160   : > { %p1145_p3 = scmp.lt.u32.totalorder %s1143_s26, %s1139_s13  ;;  %p1147_p6 = scmp.lt.u32.totalorder %s1139_s13, %s1443_s8 }
 0x161   : > { %p1141_p7 = pnand %p1140_p5, %p1500_p12 }
 0x162   : > { %p1146_p11 = por %p1145_p3, %p1144_p1 }
 0x163   : > { %p1142_p9 = pneg %p1141_p7 }
 0x164   : > { %p1148_p13 = por %p1147_p6, %p1146_p11 }
 0x166   : > { %p1149_p8 = pnand %p1148_p13, %p1142_p9 }
 0x168   : > { %1152 = shalt.err (!%p1149_p8)
}
 0x169   : > { %s1200_s29 = smov 128   ;;  %s1201_s15 = smov 8  }
 0x16a   : > { %1032 = dma.vmem_to_hbm [thread:$0]  (%p1500_p12), %s1438_s12, 256, %s1443_s8, %s775_s7, %s1200_s29, %s1200_s29, %s1201_s15  }
 0x16b PF: > { %s803_s16 = sand.u32 1, %s1179_s18   ;;  %p1501_p10 = scmp.ne.s32.totalorder %s1498_s6, 0 }
 0x16c   : > { %p1502_p0 = scmp.ge.s32.totalorder %s1191_s21, 2  ;;  %s804_s9 = scalar_lea.sflag [#allocation4], %s803_s16 }
 0x16e   : > { %p1039_p2 = pnand %p1502_p0, %p1501_p10 }
 0x170   : > { %1174 = dma.done.wait (!%p1039_p2), %s804_s9, 256  }
 0x171   : > { %1176 = vsyncadd (!%p1039_p2), %s804_s9, 4294967040  ;;  %p18_p4 = scmp.ge.s32.totalorder %s1257_s24, 4   ;;  %s1503_s18 = smov %s1183_s19 }
 0x172   : > { %s1504_s19 = smov %s1187_s20  ;;  %s1505_s20 = smov %s1269_s27 }
 0x173   : > { %s1506_s21 = smov %s1257_s24  ;;  %20 = sbr.rel (!%p18_p4) target bundleno = 5 (0x5), region = 97 }
 0x17a   :  { %809 = vsyncpa [#allocation3], 1 }
 0x17b   :  { %811 = vsyncpa [#allocation3 + $0x1], 1 }
 0x17c   :  { %812 = vsyncpa [#allocation4], 1 }
 0x17d   :  { %814 = vsyncpa [#allocation4 + $0x1], 1 }

</bundles_post_ra>
